<compile_context>
chip_gen: v7x
topology: tpu7x:2x2x1
jax: 0.10.0
libtpu: 0.0.40
codegen_flags: <defaults>
</compile_context>

<pallas_src>
import functools

import jax
import jax.numpy as jnp
from jax.experimental import pallas as pl
from jax.experimental.pallas import tpu as pltpu


def _round_up(x, m):
    return (x + m - 1) // m * m


def _conv_bn_relu_kernel(patches_ref, w_ref, scale_ref, bias_ref, o_ref):
    # patches_ref: [TM, K_pad]        bf16 (per-grid-step tile)
    # w_ref:       [K_pad, Cout_pad]  bf16 (resident across the whole grid)
    # scale/bias:  [1, Cout_pad]      f32  (folded eval-mode BatchNorm, resident)
    acc = jnp.dot(patches_ref[...], w_ref[...], preferred_element_type=jnp.float32)
    y = acc * scale_ref[...] + bias_ref[...]
    o_ref[...] = jnp.maximum(y, 0.0).astype(o_ref.dtype)


def _im2col_nchw(x, kh, kw, stride, pad):
    """x: [N, C, H, W] -> patches [N*Ho*Wo, C*kh*kw] with (C, kh, kw) flattening order."""
    x = jnp.pad(x, ((0, 0), (0, 0), (pad, pad), (pad, pad)))
    N, C, Hp, Wp = x.shape
    Ho = (Hp - kh) // stride + 1
    Wo = (Wp - kw) // stride + 1
    cols = []
    for i in range(kh):
        for j in range(kw):
            cols.append(x[:, :, i:i + Ho * stride:stride, j:j + Wo * stride:stride])
    # [kh*kw, N, C, Ho, Wo] -> [N, Ho, Wo, C, kh*kw]  (rows in NHWC order)
    p = jnp.stack(cols, axis=0).transpose(1, 3, 4, 2, 0)
    return p.reshape(N * Ho * Wo, C * kh * kw), (N, Ho, Wo)


@functools.partial(jax.jit, static_argnames=("stride", "pad"))
def basic_conv2d(x, conv_w, bn_gamma, bn_beta, bn_mean, bn_var, *, stride=1, pad=1, eps=1e-3):
    """Forward of BasicConv2d.

    x:       [N, Cin, H, W]        (NCHW, PyTorch convention)
    conv_w:  [Cout, Cin, kh, kw]   (PyTorch Conv2d weight, bias=False)
    returns: [N, Cout, Ho, Wo]
    """
    Cout, Cin, kh, kw = conv_w.shape
    patches, (N, Ho, Wo) = _im2col_nchw(x, kh, kw, stride, pad)
    M, K = patches.shape

    # --- TPU-friendly padded shapes ----------------------------------------
    K_pad = _round_up(K, 16)            # bf16 sublane packing on the weight operand
    Cout_pad = _round_up(Cout, 128)     # lane-dense output + full MXU N dimension
    TM = min(512, _round_up(M, 8))      # rows of the matmul processed per grid step
    M_pad = _round_up(M, TM)
    grid = (M_pad // TM,)

    patches_p = jnp.pad(patches, ((0, M_pad - M), (0, K_pad - K))).astype(jnp.bfloat16)

    w_mat = conv_w.reshape(Cout, K).T                                   # [K, Cout]
    w_p = jnp.pad(w_mat, ((0, K_pad - K), (0, Cout_pad - Cout))).astype(jnp.bfloat16)

    # Fold eval-mode BatchNorm into per-output-channel scale / bias (f32 epilogue).
    scale = (bn_gamma.astype(jnp.float32)
             / jnp.sqrt(bn_var.astype(jnp.float32) + eps))
    bias = bn_beta.astype(jnp.float32) - bn_mean.astype(jnp.float32) * scale
    scale_p = jnp.pad(scale, (0, Cout_pad - Cout)).reshape(1, Cout_pad)
    bias_p = jnp.pad(bias, (0, Cout_pad - Cout)).reshape(1, Cout_pad)

    out_itemsize = jnp.dtype(x.dtype).itemsize

    # VMEM budget: double-buffered patch/out tiles + resident weights + headroom.
    vmem_needed = (2 * TM * K_pad * 2                    # patches tiles (bf16, 2-buf)
                   + 2 * TM * Cout_pad * out_itemsize    # output tiles (2-buf)
                   + 2 * K_pad * Cout_pad * 2            # weights (resident)
                   + 4 * Cout_pad * 4)                   # scale + bias
    vmem_limit = int(min(48 << 20, max(32 << 20, 2 * vmem_needed + (4 << 20))))

    cost = pl.CostEstimate(
        flops=2 * M_pad * K_pad * Cout_pad,
        transcendentals=0,
        bytes_accessed=(M_pad * K_pad * 2 + K_pad * Cout_pad * 2
                        + M_pad * Cout_pad * out_itemsize + 2 * Cout_pad * 4),
    )

    out_flat = pl.pallas_call(
        _conv_bn_relu_kernel,
        out_shape=jax.ShapeDtypeStruct((M_pad, Cout_pad), x.dtype),
        grid=grid,
        in_specs=[
            pl.BlockSpec((TM, K_pad), lambda i: (i, 0)),         # streamed over M
            pl.BlockSpec((K_pad, Cout_pad), lambda i: (0, 0)),   # weights resident
            pl.BlockSpec((1, Cout_pad), lambda i: (0, 0)),       # scale resident
            pl.BlockSpec((1, Cout_pad), lambda i: (0, 0)),       # bias resident
        ],
        out_specs=pl.BlockSpec((TM, Cout_pad), lambda i: (i, 0)),
        compiler_params=pltpu.CompilerParams(
            dimension_semantics=("parallel",),
            vmem_limit_bytes=vmem_limit,
        ),
        cost_estimate=cost,
    )(patches_p, w_p, scale_p, bias_p)

    # Strip padding, [M, Cout] -> NHWC -> NCHW (PyTorch output convention).
    out = out_flat[:M, :Cout].reshape(N, Ho, Wo, Cout)
    return out.transpose(0, 3, 1, 2)


def _reference(x, conv_w, bn_gamma, bn_beta, bn_mean, bn_var, stride=1, pad=1, eps=1e-3):
    y = jax.lax.conv_general_dilated(
        x, conv_w, window_strides=(stride, stride),
        padding=[(pad, pad), (pad, pad)],
        dimension_numbers=("NCHW", "OIHW", "NCHW"))
    scale = bn_gamma / jnp.sqrt(bn_var + eps)
    y = (y - bn_mean[None, :, None, None]) * scale[None, :, None, None] + bn_beta[None, :, None, None]
    return jnp.maximum(y, 0.0)


if __name__ == "__main__":
    key = jax.random.PRNGKey(0)
    k_x, k_w, k_g, k_b, k_m, k_v = jax.random.split(key, 6)

    N, Cin, H, W = 2, 4, 16, 16
    Cout, kh, kw = 8, 3, 3

    x = jax.random.normal(k_x, (N, Cin, H, W), dtype=jnp.float32)
    conv_w = jax.random.normal(k_w, (Cout, Cin, kh, kw), dtype=jnp.float32) * 0.1
    bn_gamma = jax.random.normal(k_g, (Cout,), dtype=jnp.float32) * 0.1 + 1.0
    bn_beta = jax.random.normal(k_b, (Cout,), dtype=jnp.float32) * 0.1
    bn_mean = jax.random.normal(k_m, (Cout,), dtype=jnp.float32) * 0.1
    bn_var = jax.random.uniform(k_v, (Cout,), dtype=jnp.float32, minval=0.5, maxval=1.5)

    out = basic_conv2d(x, conv_w, bn_gamma, bn_beta, bn_mean, bn_var, stride=1, pad=1)
    out = jax.block_until_ready(out)

    ref = _reference(x, conv_w, bn_gamma, bn_beta, bn_mean, bn_var)
    assert out.shape == (N, Cout, H, W), out.shape
    # bf16 MXU inputs with f32 accumulation vs. full-f32 reference -> loose tolerance.
    assert jnp.allclose(out, ref, atol=3e-2, rtol=3e-2), float(jnp.max(jnp.abs(out - ref)))

    print("KERNEL_OK")
</pallas_src>

<mosaic_0001>
module attributes {stable_mosaic.version = 11 : i64} {
  func.func @_conv_bn_relu_kernel(%arg0: i32, %arg1: memref<512x48xbf16, #tpu.memory_space<vmem>>, %arg2: memref<48x128xbf16, #tpu.memory_space<vmem>>, %arg3: memref<1x128xf32, #tpu.memory_space<vmem>>, %arg4: memref<1x128xf32, #tpu.memory_space<vmem>>, %arg5: memref<512x128xf32, #tpu.memory_space<vmem>>) attributes {dimension_semantics = [#tpu.dimension_semantics<parallel>], iteration_bounds = array<i64: 1>, scalar_prefetch = 0 : i64, scratch_operands = 0 : i64, tpu.core_type = #tpu.core_type<tc>, window_params = [{transform_indices = @transform_0, window_bounds = array<i64: 512, 48>}, {pipeline_mode = #tpu.pipeline_mode<synchronous>, transform_indices = @transform_1, window_bounds = array<i64: 48, 128>}, {pipeline_mode = #tpu.pipeline_mode<synchronous>, transform_indices = @transform_2, window_bounds = array<i64: 1, 128>}, {pipeline_mode = #tpu.pipeline_mode<synchronous>, transform_indices = @transform_3, window_bounds = array<i64: 1, 128>}, {transform_indices = @transform_4, window_bounds = array<i64: 512, 128>}]} {
    %c0 = arith.constant 0 : index
    %c0_0 = arith.constant 0 : index
    %0 = vector.load %arg1[%c0, %c0_0] : memref<512x48xbf16, #tpu.memory_space<vmem>>, vector<512x48xbf16>
    %c0_1 = arith.constant 0 : index
    %c0_2 = arith.constant 0 : index
    %1 = vector.load %arg2[%c0_1, %c0_2] : memref<48x128xbf16, #tpu.memory_space<vmem>>, vector<48x128xbf16>
    %cst = arith.constant dense<0.000000e+00> : vector<512x128xf32>
    %2 = tpu.matmul %0, %1, %cst {dimension_numbers = #tpu.dot_dimension_numbers<[1], [0], [0], [1], [0, 0, 1, 1], [], []>} : vector<512x48xbf16>, vector<48x128xbf16>, vector<512x128xf32> -> vector<512x128xf32>
    %c0_3 = arith.constant 0 : index
    %c0_4 = arith.constant 0 : index
    %3 = vector.load %arg3[%c0_3, %c0_4] : memref<1x128xf32, #tpu.memory_space<vmem>>, vector<1x128xf32>
    %4 = vector.broadcast %3 : vector<1x128xf32> to vector<512x128xf32>
    %5 = arith.mulf %2, %4 : vector<512x128xf32>
    %c0_5 = arith.constant 0 : index
    %c0_6 = arith.constant 0 : index
    %6 = vector.load %arg4[%c0_5, %c0_6] : memref<1x128xf32, #tpu.memory_space<vmem>>, vector<1x128xf32>
    %7 = vector.broadcast %6 : vector<1x128xf32> to vector<512x128xf32>
    %8 = arith.addf %5, %7 : vector<512x128xf32>
    %cst_7 = arith.constant 0.000000e+00 : f32
    %9 = vector.broadcast %cst_7 : f32 to vector<512x128xf32>
    %10 = arith.maximumf %8, %9 : vector<512x128xf32>
    %c0_8 = arith.constant 0 : index
    %c0_9 = arith.constant 0 : index
    %11 = vector.load %arg5[%c0_8, %c0_9] : memref<512x128xf32, #tpu.memory_space<vmem>>, vector<512x128xf32>
    tpu.vector_store %arg5[%c0_8, %c0_9], %10 {strides = array<i32>} : memref<512x128xf32, #tpu.memory_space<vmem>>, vector<512x128xf32>,
    return
  }
  func.func @transform_0(%arg0: i32) -> (i32, i32) {
    %c0_i32 = arith.constant 0 : i32
    %c0_i32_0 = arith.constant 0 : i32
    return %arg0, %c0_i32 : i32, i32
  }
  func.func @transform_1(%arg0: i32) -> (i32, i32) {
    %c0_i32 = arith.constant 0 : i32
    %c0_i32_0 = arith.constant 0 : i32
    %c0_i32_1 = arith.constant 0 : i32
    return %c0_i32, %c0_i32_0 : i32, i32
  }
  func.func @transform_2(%arg0: i32) -> (i32, i32) {
    %c0_i32 = arith.constant 0 : i32
    %c0_i32_0 = arith.constant 0 : i32
    %c0_i32_1 = arith.constant 0 : i32
    return %c0_i32, %c0_i32_0 : i32, i32
  }
  func.func @transform_3(%arg0: i32) -> (i32, i32) {
    %c0_i32 = arith.constant 0 : i32
    %c0_i32_0 = arith.constant 0 : i32
    %c0_i32_1 = arith.constant 0 : i32
    return %c0_i32, %c0_i32_0 : i32, i32
  }
  func.func @transform_4(%arg0: i32) -> (i32, i32) {
    %c0_i32 = arith.constant 0 : i32
    %c0_i32_0 = arith.constant 0 : i32
    return %arg0, %c0_i32 : i32, i32
  }
}

</mosaic_0001>

<bundles_post_ra>
// kernel: basic_conv2d.1
= control target key start
LH: loop header
LB: loop body
LE: loop exit
PB: predicated region body
PF: predicated region fallthrough
CT: control target
= control target key end

     0   :  { %vm266_vm0 = vcmask 392192   ;;  %s1633_s1 = inlined_call_operand.vmem [shape: bf16[48,128], index: 1, kind: input, shape index: {}]   ;;  %s1634_s0 = inlined_call_operand.vmem [shape: bf16[512,48], index: 0, kind: input, shape index: {}]   ;;  %s1635_s2 = inlined_call_operand.vmem [shape: f32[1,128], index: 2, kind: input, shape index: {}]   ;;  %s1636_s3 = inlined_call_operand.vmem [shape: f32[1,128], index: 3, kind: input, shape index: {}]   ;;  %s1637_s4 = inlined_call_operand.vmem [shape: f32[512,128], index: 4, kind: output, shape index: {}]  }
   0x1   :  { %v1106_v0 = vld [vmem:[%s1633_s1] sm:$0xff]   ;;  %v1107_v1 = vld [vmem:[%s1633_s1 + $0x8] sm:$0xff]   ;;  %v1108_v2 = vld [vmem:[%s1633_s1 + $0x10] sm:$0xff]  }
   0x2   :  { %1030 = vmatprep.subr.bf16.mxu0 %v1106_v0  ;;  %1100 = vmatprep.subr.bf16.mxu1 %v1106_v0  ;;  %v1109_v3 = vld [vmem:[%s1634_s0] sm:$0xff]   ;;  %v1111_v5 = vld [vmem:[%s1634_s0 + $0x8] sm:$0xff]   ;;  %v1113_v7 = vld [vmem:[%s1634_s0 + $0x10] sm:$0xff]  }
   0x3   :  { %1031 = vmatpush3.bf16.msra.mxu0 %v1106_v0  ;;  %1103 = vmatpush3.bf16.msra.mxu1 %v1106_v0  ;;  %v1110_v4 = vld [vmem:[%s1634_s0 + $0x80] sm:$0xff]   ;;  %v1112_v6 = vld [vmem:[%s1634_s0 + $0x88] sm:$0xff]   ;;  %v1114_v8 = vld [vmem:[%s1634_s0 + $0x90] sm:$0xff]  }
   0x4   :  { %1032 = vmatprep.subr.bf16.mxu0 %v1107_v1  ;;  %1101 = vmatprep.subr.bf16.mxu1 %v1107_v1  ;;  %v1115_v9 = vld [vmem:[%s1634_s0 + $0x18] sm:$0xff]   ;;  %v1117_v11 = vld [vmem:[%s1634_s0 + $0x20] sm:$0xff]   ;;  %v1119_v13 = vld [vmem:[%s1634_s0 + $0x28] sm:$0xff]  }
   0x5   :  { %1036 = vmatprep.mubr.msk.bf16.mxu0 %vm266_vm0, %v1109_v3  ;;  %1068 = vmatprep.mubr.msk.bf16.mxu1 %vm266_vm0, %v1110_v4  ;;  %v1116_v10 = vld [vmem:[%s1634_s0 + $0x98] sm:$0xff]   ;;  %v1118_v12 = vld [vmem:[%s1634_s0 + $0xa0] sm:$0xff]   ;;  %v1120_v14 = vld [vmem:[%s1634_s0 + $0xa8] sm:$0xff]  }
   0x6   :  { %v1121_v15 = vld [vmem:[%s1634_s0 + $0x30] sm:$0xff]   ;;  %v1123_v17 = vld [vmem:[%s1634_s0 + $0x38] sm:$0xff]   ;;  %v1125_v19 = vld [vmem:[%s1634_s0 + $0x40] sm:$0xff]  }
   0x7   :  { %1033 = vmatpush3.bf16.msra.mxu0 %v1107_v1  ;;  %1104 = vmatpush3.bf16.msra.mxu1 %v1107_v1  ;;  %v1122_v16 = vld [vmem:[%s1634_s0 + $0xb0] sm:$0xff]   ;;  %v1124_v18 = vld [vmem:[%s1634_s0 + $0xb8] sm:$0xff]   ;;  %v1126_v20 = vld [vmem:[%s1634_s0 + $0xc0] sm:$0xff]  }
   0x8   :  { %1034 = vmatprep.subr.bf16.mxu0 %v1108_v2  ;;  %1102 = vmatprep.subr.bf16.mxu1 %v1108_v2  ;;  %v1127_v21 = vld [vmem:[%s1634_s0 + $0x48] sm:$0xff]   ;;  %v1129_v23 = vld [vmem:[%s1634_s0 + $0x50] sm:$0xff]   ;;  %v1131_v25 = vld [vmem:[%s1634_s0 + $0x58] sm:$0xff]  }
   0x9   :  { %v1128_v22 = vld [vmem:[%s1634_s0 + $0xc8] sm:$0xff]   ;;  %v1130_v24 = vld [vmem:[%s1634_s0 + $0xd0] sm:$0xff]   ;;  %v1132_v26 = vld [vmem:[%s1634_s0 + $0xd8] sm:$0xff]  }
   0xa   :  { %v1133_v27 = vld [vmem:[%s1634_s0 + $0x60] sm:$0xff]   ;;  %v1135_v29 = vld [vmem:[%s1634_s0 + $0x68] sm:$0xff]   ;;  %v1137_v31 = vld [vmem:[%s1634_s0 + $0x70] sm:$0xff]  }
   0xb   :  { %1035 = vmatpush3.bf16.msra.mxu0 %v1108_v2  ;;  %1105 = vmatpush3.bf16.msra.mxu1 %v1108_v2  ;;  %v1134_v28 = vld [vmem:[%s1634_s0 + $0xe0] sm:$0xff]   ;;  %v1136_v30 = vld [vmem:[%s1634_s0 + $0xe8] sm:$0xff]   ;;  %v1138_v32 = vld [vmem:[%s1634_s0 + $0xf0] sm:$0xff]  }
   0xc   :  { %v1139_v33 = vld [vmem:[%s1634_s0 + $0x78] sm:$0xff]   ;;  %v1306_v35 = vld [vmem:[%s1635_s2] ss:$0 sm:$0xff] }
   0xd   :  { %v1140_v34 = vld [vmem:[%s1634_s0 + $0xf8] sm:$0xff]   ;;  %v1311_v37 = vld [vmem:[%s1636_s3] ss:$0 sm:$0xff] }
   0xe   :  { %1037 = vmatmul.mubr.msk.bf16.vlgmr.msra.gmra.mrb[0].mxu0 %vm266_vm0, %v1111_v5  ;;  %1069 = vmatmul.mubr.msk.bf16.vlgmr.msra.gmra.mrb[0].mxu1 %vm266_vm0, %v1112_v6 }
   0xf   :  { %1040 = vmatprep.mubr.msk.bf16.mxu0 %vm266_vm0, %v1113_v7  ;;  %1072 = vmatprep.mubr.msk.bf16.mxu1 %vm266_vm0, %v1114_v8 }
  0x16   :  { %1041 = vmatmul.mubr.msk.bf16.gmra.mrb[4].mxu0 %vm266_vm0, %v1115_v9  ;;  %1073 = vmatmul.mubr.msk.bf16.gmra.mrb[4].mxu1 %vm266_vm0, %v1116_v10 }
  0x17   :  { %1044 = vmatprep.mubr.msk.bf16.mxu0 %vm266_vm0, %v1117_v11  ;;  %1076 = vmatprep.mubr.msk.bf16.mxu1 %vm266_vm0, %v1118_v12 }
  0x1e   :  { %1045 = vmatmul.mubr.msk.bf16.gmra.mrb[8].mxu0 %vm266_vm0, %v1119_v13  ;;  %1077 = vmatmul.mubr.msk.bf16.gmra.mrb[8].mxu1 %vm266_vm0, %v1120_v14 }
  0x1f   :  { %1048 = vmatprep.mubr.msk.bf16.mxu0 %vm266_vm0, %v1121_v15  ;;  %1080 = vmatprep.mubr.msk.bf16.mxu1 %vm266_vm0, %v1122_v16 }
  0x26   :  { %1049 = vmatmul.mubr.msk.bf16.gmra.mrb[12].mxu0 %vm266_vm0, %v1123_v17  ;;  %1081 = vmatmul.mubr.msk.bf16.gmra.mrb[12].mxu1 %vm266_vm0, %v1124_v18 }
  0x27   :  { %1052 = vmatprep.mubr.msk.bf16.mxu0 %vm266_vm0, %v1125_v19  ;;  %1084 = vmatprep.mubr.msk.bf16.mxu1 %vm266_vm0, %v1126_v20 }
  0x2e   :  { %1053 = vmatmul.mubr.msk.bf16.gmra.mrb[16].mxu0 %vm266_vm0, %v1127_v21  ;;  %1085 = vmatmul.mubr.msk.bf16.gmra.mrb[16].mxu1 %vm266_vm0, %v1128_v22 }
  0x2f   :  { %1056 = vmatprep.mubr.msk.bf16.mxu0 %vm266_vm0, %v1129_v23  ;;  %1088 = vmatprep.mubr.msk.bf16.mxu1 %vm266_vm0, %v1130_v24 }
  0x36   :  { %1057 = vmatmul.mubr.msk.bf16.gmra.mrb[20].mxu0 %vm266_vm0, %v1131_v25  ;;  %1089 = vmatmul.mubr.msk.bf16.gmra.mrb[20].mxu1 %vm266_vm0, %v1132_v26 }
  0x37   :  { %1060 = vmatprep.mubr.msk.bf16.mxu0 %vm266_vm0, %v1133_v27  ;;  %1092 = vmatprep.mubr.msk.bf16.mxu1 %vm266_vm0, %v1134_v28 }
  0x3e   :  { %1061 = vmatmul.mubr.msk.bf16.gmra.mrb[24].mxu0 %vm266_vm0, %v1135_v29  ;;  %1093 = vmatmul.mubr.msk.bf16.gmra.mrb[24].mxu1 %vm266_vm0, %v1136_v30 }
  0x3f   :  { %1064 = vmatprep.mubr.msk.bf16.mxu0 %vm266_vm0, %v1137_v31  ;;  %1096 = vmatprep.mubr.msk.bf16.mxu1 %vm266_vm0, %v1138_v32 }
  0x46   :  { %1065 = vmatmul.mubr.msk.bf16.gmra.mrb[28].mxu0 %vm266_vm0, %v1139_v33  ;;  %1097 = vmatmul.mubr.msk.bf16.gmra.mrb[28].mxu1 %vm266_vm0, %v1140_v34 }
  0xe1   :  { %v1038_v36 = vpop.f32.mrb[0].mxu0  ;;  %v1070_v38 = vpop.f32.mrb[0].mxu1 }
  0xe2   :  { %v661_v39 = vmul.f32 %v1038_v36, %v1306_v35  ;;  %v693_v40 = vmul.f32 %v1070_v38, %v1306_v35  ;;  %v397_v41 = vpop.f32.mrb[1].mxu0  ;;  %v525_v42 = vpop.f32.mrb[1].mxu1 }
  0xe3   :  { %v659_v43 = vmul.f32 %v1306_v35, %v397_v41  ;;  %v691_v44 = vmul.f32 %v1306_v35, %v525_v42  ;;  %v1039_v45 = vpop.f32.mrb[2].mxu0  ;;  %v1071_v46 = vpop.f32.mrb[2].mxu1 }
  0xe4   :  { %v732_v47 = vadd.f32 %v1311_v37, %v661_v39  ;;  %v764_v48 = vadd.f32 %v1311_v37, %v693_v40  ;;  %v662_v49 = vmul.f32 %v1039_v45, %v1306_v35  ;;  %v694_v50 = vmul.f32 %v1071_v46, %v1306_v35  ;;  %v400_v51 = vpop.f32.mrb[3].mxu0  ;;  %v528_v52 = vpop.f32.mrb[3].mxu1 }
  0xe5   :  { %v730_v53 = vadd.f32 %v1311_v37, %v659_v43  ;;  %v762_v54 = vadd.f32 %v1311_v37, %v691_v44  ;;  %v660_v55 = vmul.f32 %v1306_v35, %v400_v51  ;;  %v692_v56 = vmul.f32 %v1306_v35, %v528_v52 }
  0xe6   :  { %v796_v57 = vmax.f32 %v732_v47, 0.0  ;;  %v828_v58 = vmax.f32 %v764_v48, 0.0  ;;  %v733_v59 = vadd.f32 %v1311_v37, %v662_v49  ;;  %v765_v60 = vadd.f32 %v1311_v37, %v694_v50 }
  0xe7   :  { %v794_v61 = vmax.f32 %v730_v53, 0.0  ;;  %v826_v62 = vmax.f32 %v762_v54, 0.0  ;;  %v731_v63 = vadd.f32 %v1311_v37, %v660_v55  ;;  %v763_v0 = vadd.f32 %v1311_v37, %v692_v56 }
  0xe8   :  { %860 = vst [vmem:[%s1637_s4 + $0x10] sm:$0xff] %v796_v57  ;;  %892 = vst [vmem:[%s1637_s4 + $0x110] sm:$0xff] %v828_v58  ;;  %v797_v1 = vmax.f32 %v733_v59, 0.0  ;;  %v829_v2 = vmax.f32 %v765_v60, 0.0 }
  0xe9   :  { %858 = vst [vmem:[%s1637_s4] sm:$0xff] %v794_v61  ;;  %890 = vst [vmem:[%s1637_s4 + $0x100] sm:$0xff] %v826_v62  ;;  %v795_v3 = vmax.f32 %v731_v63, 0.0  ;;  %v827_v4 = vmax.f32 %v763_v0, 0.0  ;;  %v1042_v5 = vpop.f32.mrb[4].mxu0  ;;  %v1074_v6 = vpop.f32.mrb[4].mxu1 }
  0xea   :  { %861 = vst [vmem:[%s1637_s4 + $0x18] sm:$0xff] %v797_v1  ;;  %893 = vst [vmem:[%s1637_s4 + $0x118] sm:$0xff] %v829_v2  ;;  %v665_v7 = vmul.f32 %v1042_v5, %v1306_v35  ;;  %v697_v8 = vmul.f32 %v1074_v6, %v1306_v35  ;;  %v413_v9 = vpop.f32.mrb[5].mxu0  ;;  %v541_v10 = vpop.f32.mrb[5].mxu1 }
  0xeb   :  { %859 = vst [vmem:[%s1637_s4 + $0x8] sm:$0xff] %v795_v3  ;;  %891 = vst [vmem:[%s1637_s4 + $0x108] sm:$0xff] %v827_v4  ;;  %v663_v11 = vmul.f32 %v1306_v35, %v413_v9  ;;  %v695_v12 = vmul.f32 %v1306_v35, %v541_v10  ;;  %v1043_v13 = vpop.f32.mrb[6].mxu0  ;;  %v1075_v14 = vpop.f32.mrb[6].mxu1 }
  0xec   :  { %v736_v15 = vadd.f32 %v1311_v37, %v665_v7  ;;  %v768_v16 = vadd.f32 %v1311_v37, %v697_v8  ;;  %v666_v17 = vmul.f32 %v1043_v13, %v1306_v35  ;;  %v698_v18 = vmul.f32 %v1075_v14, %v1306_v35  ;;  %v416_v19 = vpop.f32.mrb[7].mxu0  ;;  %v544_v20 = vpop.f32.mrb[7].mxu1 }
  0xed   :  { %v734_v21 = vadd.f32 %v1311_v37, %v663_v11  ;;  %v766_v22 = vadd.f32 %v1311_v37, %v695_v12  ;;  %v664_v23 = vmul.f32 %v1306_v35, %v416_v19  ;;  %v696_v24 = vmul.f32 %v1306_v35, %v544_v20 }
  0xee   :  { %v800_v25 = vmax.f32 %v736_v15, 0.0  ;;  %v832_v26 = vmax.f32 %v768_v16, 0.0  ;;  %v737_v27 = vadd.f32 %v1311_v37, %v666_v17  ;;  %v769_v28 = vadd.f32 %v1311_v37, %v698_v18 }
  0xef   :  { %v798_v29 = vmax.f32 %v734_v21, 0.0  ;;  %v830_v30 = vmax.f32 %v766_v22, 0.0  ;;  %v735_v31 = vadd.f32 %v1311_v37, %v664_v23  ;;  %v767_v32 = vadd.f32 %v1311_v37, %v696_v24 }
  0xf0   :  { %864 = vst [vmem:[%s1637_s4 + $0x30] sm:$0xff] %v800_v25  ;;  %896 = vst [vmem:[%s1637_s4 + $0x130] sm:$0xff] %v832_v26  ;;  %v801_v33 = vmax.f32 %v737_v27, 0.0  ;;  %v833_v34 = vmax.f32 %v769_v28, 0.0 }
  0xf1   :  { %862 = vst [vmem:[%s1637_s4 + $0x20] sm:$0xff] %v798_v29  ;;  %894 = vst [vmem:[%s1637_s4 + $0x120] sm:$0xff] %v830_v30  ;;  %v799_v36 = vmax.f32 %v735_v31, 0.0  ;;  %v831_v38 = vmax.f32 %v767_v32, 0.0  ;;  %v1046_v39 = vpop.f32.mrb[8].mxu0  ;;  %v1078_v40 = vpop.f32.mrb[8].mxu1 }
  0xf2   :  { %865 = vst [vmem:[%s1637_s4 + $0x38] sm:$0xff] %v801_v33  ;;  %897 = vst [vmem:[%s1637_s4 + $0x138] sm:$0xff] %v833_v34  ;;  %v669_v41 = vmul.f32 %v1046_v39, %v1306_v35  ;;  %v701_v42 = vmul.f32 %v1078_v40, %v1306_v35  ;;  %v429_v43 = vpop.f32.mrb[9].mxu0  ;;  %v557_v44 = vpop.f32.mrb[9].mxu1 }
  0xf3   :  { %863 = vst [vmem:[%s1637_s4 + $0x28] sm:$0xff] %v799_v36  ;;  %895 = vst [vmem:[%s1637_s4 + $0x128] sm:$0xff] %v831_v38  ;;  %v667_v45 = vmul.f32 %v1306_v35, %v429_v43  ;;  %v699_v46 = vmul.f32 %v1306_v35, %v557_v44  ;;  %v1047_v47 = vpop.f32.mrb[10].mxu0  ;;  %v1079_v48 = vpop.f32.mrb[10].mxu1 }
  0xf4   :  { %v740_v49 = vadd.f32 %v1311_v37, %v669_v41  ;;  %v772_v50 = vadd.f32 %v1311_v37, %v701_v42  ;;  %v670_v51 = vmul.f32 %v1047_v47, %v1306_v35  ;;  %v702_v52 = vmul.f32 %v1079_v48, %v1306_v35  ;;  %v432_v53 = vpop.f32.mrb[11].mxu0  ;;  %v560_v54 = vpop.f32.mrb[11].mxu1 }
  0xf5   :  { %v738_v55 = vadd.f32 %v1311_v37, %v667_v45  ;;  %v770_v56 = vadd.f32 %v1311_v37, %v699_v46  ;;  %v668_v57 = vmul.f32 %v1306_v35, %v432_v53  ;;  %v700_v58 = vmul.f32 %v1306_v35, %v560_v54 }
  0xf6   :  { %v804_v59 = vmax.f32 %v740_v49, 0.0  ;;  %v836_v60 = vmax.f32 %v772_v50, 0.0  ;;  %v741_v61 = vadd.f32 %v1311_v37, %v670_v51  ;;  %v773_v62 = vadd.f32 %v1311_v37, %v702_v52 }
  0xf7   :  { %v802_v63 = vmax.f32 %v738_v55, 0.0  ;;  %v834_v0 = vmax.f32 %v770_v56, 0.0  ;;  %v739_v1 = vadd.f32 %v1311_v37, %v668_v57  ;;  %v771_v2 = vadd.f32 %v1311_v37, %v700_v58 }
  0xf8   :  { %868 = vst [vmem:[%s1637_s4 + $0x50] sm:$0xff] %v804_v59  ;;  %900 = vst [vmem:[%s1637_s4 + $0x150] sm:$0xff] %v836_v60  ;;  %v805_v3 = vmax.f32 %v741_v61, 0.0  ;;  %v837_v4 = vmax.f32 %v773_v62, 0.0 }
  0xf9   :  { %866 = vst [vmem:[%s1637_s4 + $0x40] sm:$0xff] %v802_v63  ;;  %898 = vst [vmem:[%s1637_s4 + $0x140] sm:$0xff] %v834_v0  ;;  %v803_v5 = vmax.f32 %v739_v1, 0.0  ;;  %v835_v6 = vmax.f32 %v771_v2, 0.0  ;;  %v1050_v7 = vpop.f32.mrb[12].mxu0  ;;  %v1082_v8 = vpop.f32.mrb[12].mxu1 }
  0xfa   :  { %869 = vst [vmem:[%s1637_s4 + $0x58] sm:$0xff] %v805_v3  ;;  %901 = vst [vmem:[%s1637_s4 + $0x158] sm:$0xff] %v837_v4  ;;  %v673_v9 = vmul.f32 %v1050_v7, %v1306_v35  ;;  %v705_v10 = vmul.f32 %v1082_v8, %v1306_v35  ;;  %v445_v11 = vpop.f32.mrb[13].mxu0  ;;  %v573_v12 = vpop.f32.mrb[13].mxu1 }
  0xfb   :  { %867 = vst [vmem:[%s1637_s4 + $0x48] sm:$0xff] %v803_v5  ;;  %899 = vst [vmem:[%s1637_s4 + $0x148] sm:$0xff] %v835_v6  ;;  %v671_v13 = vmul.f32 %v1306_v35, %v445_v11  ;;  %v703_v14 = vmul.f32 %v1306_v35, %v573_v12  ;;  %v1051_v15 = vpop.f32.mrb[14].mxu0  ;;  %v1083_v16 = vpop.f32.mrb[14].mxu1 }
  0xfc   :  { %v744_v17 = vadd.f32 %v1311_v37, %v673_v9  ;;  %v776_v18 = vadd.f32 %v1311_v37, %v705_v10  ;;  %v674_v19 = vmul.f32 %v1051_v15, %v1306_v35  ;;  %v706_v20 = vmul.f32 %v1083_v16, %v1306_v35  ;;  %v448_v21 = vpop.f32.mrb[15].mxu0  ;;  %v576_v22 = vpop.f32.mrb[15].mxu1 }
  0xfd   :  { %v742_v23 = vadd.f32 %v1311_v37, %v671_v13  ;;  %v774_v24 = vadd.f32 %v1311_v37, %v703_v14  ;;  %v672_v25 = vmul.f32 %v1306_v35, %v448_v21  ;;  %v704_v26 = vmul.f32 %v1306_v35, %v576_v22 }
  0xfe   :  { %v808_v27 = vmax.f32 %v744_v17, 0.0  ;;  %v840_v28 = vmax.f32 %v776_v18, 0.0  ;;  %v745_v29 = vadd.f32 %v1311_v37, %v674_v19  ;;  %v777_v30 = vadd.f32 %v1311_v37, %v706_v20 }
  0xff   :  { %v806_v31 = vmax.f32 %v742_v23, 0.0  ;;  %v838_v32 = vmax.f32 %v774_v24, 0.0  ;;  %v743_v33 = vadd.f32 %v1311_v37, %v672_v25  ;;  %v775_v34 = vadd.f32 %v1311_v37, %v704_v26 }
 0x100   :  { %872 = vst [vmem:[%s1637_s4 + $0x70] sm:$0xff] %v808_v27  ;;  %904 = vst [vmem:[%s1637_s4 + $0x170] sm:$0xff] %v840_v28  ;;  %v809_v36 = vmax.f32 %v745_v29, 0.0  ;;  %v841_v38 = vmax.f32 %v777_v30, 0.0 }
 0x101   :  { %870 = vst [vmem:[%s1637_s4 + $0x60] sm:$0xff] %v806_v31  ;;  %902 = vst [vmem:[%s1637_s4 + $0x160] sm:$0xff] %v838_v32  ;;  %v807_v39 = vmax.f32 %v743_v33, 0.0  ;;  %v839_v40 = vmax.f32 %v775_v34, 0.0  ;;  %v1054_v41 = vpop.f32.mrb[16].mxu0  ;;  %v1086_v42 = vpop.f32.mrb[16].mxu1 }
 0x102   :  { %873 = vst [vmem:[%s1637_s4 + $0x78] sm:$0xff] %v809_v36  ;;  %905 = vst [vmem:[%s1637_s4 + $0x178] sm:$0xff] %v841_v38  ;;  %v677_v43 = vmul.f32 %v1054_v41, %v1306_v35  ;;  %v709_v44 = vmul.f32 %v1086_v42, %v1306_v35  ;;  %v461_v45 = vpop.f32.mrb[17].mxu0  ;;  %v589_v46 = vpop.f32.mrb[17].mxu1 }
 0x103   :  { %871 = vst [vmem:[%s1637_s4 + $0x68] sm:$0xff] %v807_v39  ;;  %903 = vst [vmem:[%s1637_s4 + $0x168] sm:$0xff] %v839_v40  ;;  %v675_v47 = vmul.f32 %v1306_v35, %v461_v45  ;;  %v707_v48 = vmul.f32 %v1306_v35, %v589_v46  ;;  %v1055_v49 = vpop.f32.mrb[18].mxu0  ;;  %v1087_v50 = vpop.f32.mrb[18].mxu1 }
 0x104   :  { %v748_v51 = vadd.f32 %v1311_v37, %v677_v43  ;;  %v780_v52 = vadd.f32 %v1311_v37, %v709_v44  ;;  %v678_v53 = vmul.f32 %v1055_v49, %v1306_v35  ;;  %v710_v54 = vmul.f32 %v1087_v50, %v1306_v35  ;;  %v464_v55 = vpop.f32.mrb[19].mxu0  ;;  %v592_v56 = vpop.f32.mrb[19].mxu1 }
 0x105   :  { %v746_v57 = vadd.f32 %v1311_v37, %v675_v47  ;;  %v778_v58 = vadd.f32 %v1311_v37, %v707_v48  ;;  %v676_v59 = vmul.f32 %v1306_v35, %v464_v55  ;;  %v708_v60 = vmul.f32 %v1306_v35, %v592_v56 }
 0x106   :  { %v812_v61 = vmax.f32 %v748_v51, 0.0  ;;  %v844_v62 = vmax.f32 %v780_v52, 0.0  ;;  %v749_v63 = vadd.f32 %v1311_v37, %v678_v53  ;;  %v781_v0 = vadd.f32 %v1311_v37, %v710_v54 }
 0x107   :  { %v810_v1 = vmax.f32 %v746_v57, 0.0  ;;  %v842_v2 = vmax.f32 %v778_v58, 0.0  ;;  %v747_v3 = vadd.f32 %v1311_v37, %v676_v59  ;;  %v779_v4 = vadd.f32 %v1311_v37, %v708_v60 }
 0x108   :  { %876 = vst [vmem:[%s1637_s4 + $0x90] sm:$0xff] %v812_v61  ;;  %908 = vst [vmem:[%s1637_s4 + $0x190] sm:$0xff] %v844_v62  ;;  %v813_v5 = vmax.f32 %v749_v63, 0.0  ;;  %v845_v6 = vmax.f32 %v781_v0, 0.0 }
 0x109   :  { %874 = vst [vmem:[%s1637_s4 + $0x80] sm:$0xff] %v810_v1  ;;  %906 = vst [vmem:[%s1637_s4 + $0x180] sm:$0xff] %v842_v2  ;;  %v811_v7 = vmax.f32 %v747_v3, 0.0  ;;  %v843_v8 = vmax.f32 %v779_v4, 0.0  ;;  %v1058_v9 = vpop.f32.mrb[20].mxu0  ;;  %v1090_v10 = vpop.f32.mrb[20].mxu1 }
 0x10a   :  { %877 = vst [vmem:[%s1637_s4 + $0x98] sm:$0xff] %v813_v5  ;;  %909 = vst [vmem:[%s1637_s4 + $0x198] sm:$0xff] %v845_v6  ;;  %v681_v11 = vmul.f32 %v1058_v9, %v1306_v35  ;;  %v713_v12 = vmul.f32 %v1090_v10, %v1306_v35  ;;  %v477_v13 = vpop.f32.mrb[21].mxu0  ;;  %v605_v14 = vpop.f32.mrb[21].mxu1 }
 0x10b   :  { %875 = vst [vmem:[%s1637_s4 + $0x88] sm:$0xff] %v811_v7  ;;  %907 = vst [vmem:[%s1637_s4 + $0x188] sm:$0xff] %v843_v8  ;;  %v679_v15 = vmul.f32 %v1306_v35, %v477_v13  ;;  %v711_v16 = vmul.f32 %v1306_v35, %v605_v14  ;;  %v1059_v17 = vpop.f32.mrb[22].mxu0  ;;  %v1091_v18 = vpop.f32.mrb[22].mxu1 }
 0x10c   :  { %v752_v19 = vadd.f32 %v1311_v37, %v681_v11  ;;  %v784_v20 = vadd.f32 %v1311_v37, %v713_v12  ;;  %v682_v21 = vmul.f32 %v1059_v17, %v1306_v35  ;;  %v714_v22 = vmul.f32 %v1091_v18, %v1306_v35  ;;  %v480_v23 = vpop.f32.mrb[23].mxu0  ;;  %v608_v24 = vpop.f32.mrb[23].mxu1 }
 0x10d   :  { %v750_v25 = vadd.f32 %v1311_v37, %v679_v15  ;;  %v782_v26 = vadd.f32 %v1311_v37, %v711_v16  ;;  %v680_v27 = vmul.f32 %v1306_v35, %v480_v23  ;;  %v712_v28 = vmul.f32 %v1306_v35, %v608_v24 }
 0x10e   :  { %v816_v29 = vmax.f32 %v752_v19, 0.0  ;;  %v848_v30 = vmax.f32 %v784_v20, 0.0  ;;  %v753_v31 = vadd.f32 %v1311_v37, %v682_v21  ;;  %v785_v32 = vadd.f32 %v1311_v37, %v714_v22 }
 0x10f   :  { %v814_v33 = vmax.f32 %v750_v25, 0.0  ;;  %v846_v34 = vmax.f32 %v782_v26, 0.0  ;;  %v751_v36 = vadd.f32 %v1311_v37, %v680_v27  ;;  %v783_v38 = vadd.f32 %v1311_v37, %v712_v28 }
 0x110   :  { %880 = vst [vmem:[%s1637_s4 + $0xb0] sm:$0xff] %v816_v29  ;;  %912 = vst [vmem:[%s1637_s4 + $0x1b0] sm:$0xff] %v848_v30  ;;  %v817_v39 = vmax.f32 %v753_v31, 0.0  ;;  %v849_v40 = vmax.f32 %v785_v32, 0.0 }
 0x111   :  { %878 = vst [vmem:[%s1637_s4 + $0xa0] sm:$0xff] %v814_v33  ;;  %910 = vst [vmem:[%s1637_s4 + $0x1a0] sm:$0xff] %v846_v34  ;;  %v815_v41 = vmax.f32 %v751_v36, 0.0  ;;  %v847_v42 = vmax.f32 %v783_v38, 0.0  ;;  %v1062_v43 = vpop.f32.mrb[24].mxu0  ;;  %v1094_v44 = vpop.f32.mrb[24].mxu1 }
 0x112   :  { %881 = vst [vmem:[%s1637_s4 + $0xb8] sm:$0xff] %v817_v39  ;;  %913 = vst [vmem:[%s1637_s4 + $0x1b8] sm:$0xff] %v849_v40  ;;  %v685_v45 = vmul.f32 %v1062_v43, %v1306_v35  ;;  %v717_v46 = vmul.f32 %v1094_v44, %v1306_v35  ;;  %v493_v47 = vpop.f32.mrb[25].mxu0  ;;  %v621_v48 = vpop.f32.mrb[25].mxu1 }
 0x113   :  { %879 = vst [vmem:[%s1637_s4 + $0xa8] sm:$0xff] %v815_v41  ;;  %911 = vst [vmem:[%s1637_s4 + $0x1a8] sm:$0xff] %v847_v42  ;;  %v683_v49 = vmul.f32 %v1306_v35, %v493_v47  ;;  %v715_v50 = vmul.f32 %v1306_v35, %v621_v48  ;;  %v1063_v51 = vpop.f32.mrb[26].mxu0  ;;  %v1095_v52 = vpop.f32.mrb[26].mxu1 }
 0x114   :  { %v756_v53 = vadd.f32 %v1311_v37, %v685_v45  ;;  %v788_v54 = vadd.f32 %v1311_v37, %v717_v46  ;;  %v686_v55 = vmul.f32 %v1063_v51, %v1306_v35  ;;  %v718_v56 = vmul.f32 %v1095_v52, %v1306_v35  ;;  %v496_v57 = vpop.f32.mrb[27].mxu0  ;;  %v624_v58 = vpop.f32.mrb[27].mxu1 }
 0x115   :  { %v754_v59 = vadd.f32 %v1311_v37, %v683_v49  ;;  %v786_v60 = vadd.f32 %v1311_v37, %v715_v50  ;;  %v684_v61 = vmul.f32 %v1306_v35, %v496_v57  ;;  %v716_v62 = vmul.f32 %v1306_v35, %v624_v58 }
 0x116   :  { %v820_v63 = vmax.f32 %v756_v53, 0.0  ;;  %v852_v0 = vmax.f32 %v788_v54, 0.0  ;;  %v757_v1 = vadd.f32 %v1311_v37, %v686_v55  ;;  %v789_v2 = vadd.f32 %v1311_v37, %v718_v56 }
 0x117   :  { %v818_v3 = vmax.f32 %v754_v59, 0.0  ;;  %v850_v4 = vmax.f32 %v786_v60, 0.0  ;;  %v755_v5 = vadd.f32 %v1311_v37, %v684_v61  ;;  %v787_v6 = vadd.f32 %v1311_v37, %v716_v62 }
 0x118   :  { %884 = vst [vmem:[%s1637_s4 + $0xd0] sm:$0xff] %v820_v63  ;;  %916 = vst [vmem:[%s1637_s4 + $0x1d0] sm:$0xff] %v852_v0  ;;  %v821_v7 = vmax.f32 %v757_v1, 0.0  ;;  %v853_v8 = vmax.f32 %v789_v2, 0.0 }
 0x119   :  { %882 = vst [vmem:[%s1637_s4 + $0xc0] sm:$0xff] %v818_v3  ;;  %914 = vst [vmem:[%s1637_s4 + $0x1c0] sm:$0xff] %v850_v4  ;;  %v819_v9 = vmax.f32 %v755_v5, 0.0  ;;  %v851_v10 = vmax.f32 %v787_v6, 0.0  ;;  %v1066_v11 = vpop.f32.mrb[28].mxu0  ;;  %v1098_v12 = vpop.f32.mrb[28].mxu1 }
 0x11a   :  { %885 = vst [vmem:[%s1637_s4 + $0xd8] sm:$0xff] %v821_v7  ;;  %917 = vst [vmem:[%s1637_s4 + $0x1d8] sm:$0xff] %v853_v8  ;;  %v689_v13 = vmul.f32 %v1066_v11, %v1306_v35  ;;  %v721_v14 = vmul.f32 %v1098_v12, %v1306_v35  ;;  %v509_v15 = vpop.f32.mrb[29].mxu0  ;;  %v637_v16 = vpop.f32.mrb[29].mxu1 }
 0x11b   :  { %883 = vst [vmem:[%s1637_s4 + $0xc8] sm:$0xff] %v819_v9  ;;  %915 = vst [vmem:[%s1637_s4 + $0x1c8] sm:$0xff] %v851_v10  ;;  %v687_v17 = vmul.f32 %v1306_v35, %v509_v15  ;;  %v719_v18 = vmul.f32 %v1306_v35, %v637_v16  ;;  %v1067_v19 = vpop.f32.mrb[30].mxu0  ;;  %v1099_v20 = vpop.f32.mrb[30].mxu1 }
 0x11c   :  { %v760_v21 = vadd.f32 %v1311_v37, %v689_v13  ;;  %v792_v22 = vadd.f32 %v1311_v37, %v721_v14  ;;  %v690_v23 = vmul.f32 %v1067_v19, %v1306_v35  ;;  %v722_v24 = vmul.f32 %v1099_v20, %v1306_v35  ;;  %v512_v25 = vpop.f32.mrb[31].mxu0  ;;  %v640_v26 = vpop.f32.mrb[31].mxu1 }
 0x11d   :  { %v758_v27 = vadd.f32 %v1311_v37, %v687_v17  ;;  %v790_v28 = vadd.f32 %v1311_v37, %v719_v18  ;;  %v688_v29 = vmul.f32 %v1306_v35, %v512_v25  ;;  %v720_v30 = vmul.f32 %v1306_v35, %v640_v26 }
 0x11e   :  { %v824_v31 = vmax.f32 %v760_v21, 0.0  ;;  %v856_v32 = vmax.f32 %v792_v22, 0.0  ;;  %v761_v33 = vadd.f32 %v1311_v37, %v690_v23  ;;  %v793_v34 = vadd.f32 %v1311_v37, %v722_v24 }
 0x11f   :  { %v822_v36 = vmax.f32 %v758_v27, 0.0  ;;  %v854_v38 = vmax.f32 %v790_v28, 0.0  ;;  %v759_v39 = vadd.f32 %v1311_v37, %v688_v29  ;;  %v791_v40 = vadd.f32 %v1311_v37, %v720_v30 }
 0x120   :  { %888 = vst [vmem:[%s1637_s4 + $0xf0] sm:$0xff] %v824_v31  ;;  %920 = vst [vmem:[%s1637_s4 + $0x1f0] sm:$0xff] %v856_v32  ;;  %v825_v35 = vmax.f32 %v761_v33, 0.0  ;;  %v857_v41 = vmax.f32 %v793_v34, 0.0 }
 0x121   :  { %886 = vst [vmem:[%s1637_s4 + $0xe0] sm:$0xff] %v822_v36  ;;  %918 = vst [vmem:[%s1637_s4 + $0x1e0] sm:$0xff] %v854_v38  ;;  %v823_v42 = vmax.f32 %v759_v39, 0.0  ;;  %v855_v37 = vmax.f32 %v791_v40, 0.0 }
 0x122   :  { %889 = vst [vmem:[%s1637_s4 + $0xf8] sm:$0xff] %v825_v35  ;;  %921 = vst [vmem:[%s1637_s4 + $0x1f8] sm:$0xff] %v857_v41 }
 0x123   :  { %887 = vst [vmem:[%s1637_s4 + $0xe8] sm:$0xff] %v823_v42  ;;  %919 = vst [vmem:[%s1637_s4 + $0x1e8] sm:$0xff] %v855_v37 }

</bundles_post_ra>
